<compile_context>
chip_gen: v5e
topology: v5e:2x2
jax: 0.10.0
libtpu: 0.0.40
codegen_flags: <defaults>
</compile_context>

<pallas_src>
import functools

import jax
import jax.numpy as jnp
from jax.experimental import pallas as pl
from jax.experimental.pallas import tpu as pltpu


def _attention_kernel(x_ref, wqkv_ref, o_ref, *, heads, head_dim):
    """Fused QKV projection + grouped softmax attention for one block of groups.

    Output is written already permuted to (head, group, head_dim) so the
    torch-style permute+view outside the kernel is a free reshape.
    """
    H, D = heads, head_dim
    xm = x_ref[0]                                   # (G*H, D): rows = (group, head)
    G = xm.shape[0] // H

    # Fused Q/K/V projection: one 2-D MXU matmul (softmax scale folded into W_q).
    qkv = jnp.dot(xm, wqkv_ref[...], preferred_element_type=jnp.float32)  # (G*H, 3D)
    qkv = qkv.reshape(G, H, 3 * D)
    q = qkv[:, :, 0:D]
    k = qkv[:, :, D:2 * D]
    v = qkv[:, :, 2 * D:3 * D]

    # Scores over the head axis of each group; contract last dims (no k.T).
    energy = jnp.einsum('ghd,gid->ghi', q, k,
                        preferred_element_type=jnp.float32)        # (G, H, H)
    m = jnp.max(energy, axis=-1, keepdims=True)
    p = jnp.exp(energy - m)
    denom = jnp.sum(p, axis=-1, keepdims=True)
    attn = p * pl.reciprocal(denom, approx=True)                   # softmax(dim=3)

    out = jnp.einsum('ghi,gid->ghd', attn, v,
                     preferred_element_type=jnp.float32)           # (G, H, D)

    # Emit in (H, G, D) order: fuses torch's permute(0, 2, 1, 3) into the store.
    for h in range(H):                                             # static unroll (H small)
        o_ref[0, h] = out[:, h, :].astype(o_ref.dtype)


def _fc_kernel(x_ref, wT_ref, b_ref, o_ref):
    y = jnp.dot(x_ref[...], wT_ref[...], preferred_element_type=jnp.float32)
    o_ref[...] = (y + b_ref[...]).astype(o_ref.dtype)


def prepare_params(wq, wk, wv, wfc, bfc, heads):
    """One-time weight transform, done outside the jitted forward."""
    D = wq.shape[0]
    embed = heads * D
    scale = 1.0 / float(embed) ** 0.5
    # y = x @ W^T; fold the 1/sqrt(embed) softmax scale into W_q.
    wqkv_t = jnp.concatenate([(wq * scale).T, wk.T, wv.T], axis=1)  # (D, 3D)
    return wqkv_t, wfc.T, bfc.reshape(1, embed)


def _pick_group_block(S, heads):
    """Groups per attention grid step.

    The output block's second-to-last dim is G, so G must be a multiple of 8
    (sublane aligned) or equal to the full S; prefer G dividing S so every
    grid step sees a full block.
    """
    max_rows = 2048                       # rows (= G*heads) of x per grid step
    if S * heads <= max_rows:
        return S
    G = max(8, ((max_rows // heads) // 8) * 8)
    while G > 8 and S % G:
        G -= 8
    return G if S % G == 0 else S


@functools.partial(jax.jit, static_argnames=("heads",))
def multi_head_attention(x, wqkv_t, wfc_t, bfc2d, *, heads):
    """Pallas forward pass matching MultiHeadAttention.forward(x)."""
    B, N, D = x.shape
    embed = heads * D
    assert N % heads == 0, "token count must be divisible by heads (torch .view)"
    S = N // heads

    G = _pick_group_block(S, heads)
    num_g = pl.cdiv(S, G)

    attn_out = pl.pallas_call(
        functools.partial(_attention_kernel, heads=heads, head_dim=D),
        out_shape=jax.ShapeDtypeStruct((B, heads, S, D), x.dtype),
        grid=(B, num_g),
        in_specs=[
            pl.BlockSpec((1, G * heads, D), lambda b, g: (b, g, 0)),
            pl.BlockSpec((D, 3 * D), lambda b, g: (0, 0)),      # fused QKV weight resident
        ],
        out_specs=pl.BlockSpec((1, heads, G, D), lambda b, g: (b, 0, g, 0)),
        compiler_params=pltpu.CompilerParams(
            dimension_semantics=("parallel", "parallel")),
    )(x, wqkv_t)

    # attn_out is already in torch's post-permute (B, heads, S, D) memory
    # layout, so `.contiguous().view(B, -1, embed)` is a free row-major
    # reshape here (no transpose, no extra HBM round trip).
    out2d = attn_out.reshape(B * S, embed)

    rows = B * S
    tr = rows if rows <= 512 else 512
    y = pl.pallas_call(
        _fc_kernel,
        out_shape=jax.ShapeDtypeStruct((rows, embed), x.dtype),
        grid=(pl.cdiv(rows, tr),),
        in_specs=[
            pl.BlockSpec((tr, embed), lambda i: (i, 0)),
            pl.BlockSpec((embed, embed), lambda i: (0, 0)),     # weight stays resident
            pl.BlockSpec((1, embed), lambda i: (0, 0)),
        ],
        out_specs=pl.BlockSpec((tr, embed), lambda i: (i, 0)),
        compiler_params=pltpu.CompilerParams(dimension_semantics=("parallel",)),
    )(out2d, wfc_t, bfc2d)

    return y.reshape(B, S, embed)


def multi_head_attention_ref(x, wq, wk, wv, wfc, bfc, heads):
    """Pure-JAX reference mirroring the PyTorch forward exactly."""
    B, N, D = x.shape
    embed = heads * D
    Q = x @ wq.T
    K = x @ wk.T
    V = x @ wv.T
    Q = Q.reshape(B, -1, heads, D)
    K = K.reshape(B, -1, heads, D)
    V = V.reshape(B, -1, heads, D)
    energy = Q @ jnp.transpose(K, (0, 1, 3, 2))
    attn = jax.nn.softmax(energy / jnp.sqrt(jnp.float32(embed)), axis=3)
    out = attn @ V
    out = jnp.transpose(out, (0, 2, 1, 3)).reshape(B, -1, embed)
    return out @ wfc.T + bfc


if __name__ == "__main__":
    B, heads, head_dim = 2, 4, 8
    embed = heads * head_dim          # 32
    N = 32                            # tokens per batch; divisible by heads

    key = jax.random.PRNGKey(0)
    kx, kq, kk, kv, kw, kb = jax.random.split(key, 6)

    x = jax.random.normal(kx, (B, N, head_dim), dtype=jnp.float32)

    # Deterministic "PyTorch-like" uniform init (Linear weight shape = (out, in)).
    b1 = 1.0 / head_dim ** 0.5
    b2 = 1.0 / embed ** 0.5
    wq = jax.random.uniform(kq, (head_dim, head_dim), jnp.float32, -b1, b1)
    wk = jax.random.uniform(kk, (head_dim, head_dim), jnp.float32, -b1, b1)
    wv = jax.random.uniform(kv, (head_dim, head_dim), jnp.float32, -b1, b1)
    wfc = jax.random.uniform(kw, (embed, embed), jnp.float32, -b2, b2)
    bfc = jax.random.uniform(kb, (embed,), jnp.float32, -b2, b2)

    wqkv_t, wfc_t, bfc2d = prepare_params(wq, wk, wv, wfc, bfc, heads)

    out = multi_head_attention(x, wqkv_t, wfc_t, bfc2d, heads=heads)
    out = jax.block_until_ready(out)

    ref = multi_head_attention_ref(x, wq, wk, wv, wfc, bfc, heads)
    assert out.shape == ref.shape, (out.shape, ref.shape)
    # approx EUP reciprocal in the softmax slightly loosens the tolerance.
    err = float(jnp.max(jnp.abs(out - ref)))
    assert jnp.allclose(out, ref, atol=1e-2, rtol=1e-2), err

    print("KERNEL_OK")
</pallas_src>

<mosaic_0001>
module attributes {stable_mosaic.version = 11 : i64} {
  func.func @_fc_kernel(%arg0: i32, %arg1: memref<16x32xf32, #tpu.memory_space<vmem>>, %arg2: memref<32x32xf32, #tpu.memory_space<vmem>>, %arg3: memref<1x32xf32, #tpu.memory_space<vmem>>, %arg4: memref<16x32xf32, #tpu.memory_space<vmem>>) attributes {dimension_semantics = [#tpu.dimension_semantics<parallel>], iteration_bounds = array<i64: 1>, scalar_prefetch = 0 : i64, scratch_operands = 0 : i64, tpu.core_type = #tpu.core_type<tc>, window_params = [{transform_indices = @transform_0, window_bounds = array<i64: 16, 32>}, {pipeline_mode = #tpu.pipeline_mode<synchronous>, transform_indices = @transform_1, window_bounds = array<i64: 32, 32>}, {pipeline_mode = #tpu.pipeline_mode<synchronous>, transform_indices = @transform_2, window_bounds = array<i64: 1, 32>}, {transform_indices = @transform_3, window_bounds = array<i64: 16, 32>}]} {
    %c0 = arith.constant 0 : index
    %c0_0 = arith.constant 0 : index
    %0 = vector.load %arg1[%c0, %c0_0] : memref<16x32xf32, #tpu.memory_space<vmem>>, vector<16x32xf32>
    %c0_1 = arith.constant 0 : index
    %c0_2 = arith.constant 0 : index
    %1 = vector.load %arg2[%c0_1, %c0_2] : memref<32x32xf32, #tpu.memory_space<vmem>>, vector<32x32xf32>
    %cst = arith.constant dense<0.000000e+00> : vector<16x32xf32>
    %2 = tpu.matmul %0, %1, %cst {dimension_numbers = #tpu.dot_dimension_numbers<[1], [0], [0], [1], [0, 0, 1, 1], [], []>} : vector<16x32xf32>, vector<32x32xf32>, vector<16x32xf32> -> vector<16x32xf32>
    %c0_3 = arith.constant 0 : index
    %c0_4 = arith.constant 0 : index
    %3 = vector.load %arg3[%c0_3, %c0_4] : memref<1x32xf32, #tpu.memory_space<vmem>>, vector<1x32xf32>
    %4 = vector.broadcast %3 : vector<1x32xf32> to vector<16x32xf32>
    %5 = arith.addf %2, %4 : vector<16x32xf32>
    %c0_5 = arith.constant 0 : index
    %c0_6 = arith.constant 0 : index
    %6 = vector.load %arg4[%c0_5, %c0_6] : memref<16x32xf32, #tpu.memory_space<vmem>>, vector<16x32xf32>
    tpu.vector_store %arg4[%c0_5, %c0_6], %5 {strides = array<i32>} : memref<16x32xf32, #tpu.memory_space<vmem>>, vector<16x32xf32>,
    return
  }
  func.func @transform_0(%arg0: i32) -> (i32, i32) {
    %c0_i32 = arith.constant 0 : i32
    %c0_i32_0 = arith.constant 0 : i32
    return %arg0, %c0_i32 : i32, i32
  }
  func.func @transform_1(%arg0: i32) -> (i32, i32) {
    %c0_i32 = arith.constant 0 : i32
    %c0_i32_0 = arith.constant 0 : i32
    %c0_i32_1 = arith.constant 0 : i32
    return %c0_i32, %c0_i32_0 : i32, i32
  }
  func.func @transform_2(%arg0: i32) -> (i32, i32) {
    %c0_i32 = arith.constant 0 : i32
    %c0_i32_0 = arith.constant 0 : i32
    %c0_i32_1 = arith.constant 0 : i32
    return %c0_i32, %c0_i32_0 : i32, i32
  }
  func.func @transform_3(%arg0: i32) -> (i32, i32) {
    %c0_i32 = arith.constant 0 : i32
    %c0_i32_0 = arith.constant 0 : i32
    return %arg0, %c0_i32 : i32, i32
  }
}

module attributes {stable_mosaic.version = 11 : i64} {
  func.func @_attention_kernel(%arg0: i32, %arg1: i32, %arg2: memref<1x32x8xf32, #tpu.memory_space<vmem>>, %arg3: memref<8x24xf32, #tpu.memory_space<vmem>>, %arg4: memref<1x4x8x8xf32, #tpu.memory_space<vmem>>) attributes {dimension_semantics = [#tpu.dimension_semantics<parallel>, #tpu.dimension_semantics<parallel>], iteration_bounds = array<i64: 2, 1>, scalar_prefetch = 0 : i64, scratch_operands = 0 : i64, tpu.core_type = #tpu.core_type<tc>, window_params = [{transform_indices = @transform_0, window_bounds = array<i64: 1, 32, 8>}, {pipeline_mode = #tpu.pipeline_mode<synchronous>, transform_indices = @transform_1, window_bounds = array<i64: 8, 24>}, {transform_indices = @transform_2, window_bounds = array<i64: 1, 4, 8, 8>}]} {
    %c0 = arith.constant 0 : index
    %c0_0 = arith.constant 0 : index
    %c0_1 = arith.constant 0 : index
    %0 = vector.load %arg2[%c0, %c0_0, %c0_1] : memref<1x32x8xf32, #tpu.memory_space<vmem>>, vector<1x32x8xf32>
    %1 = vector.shape_cast %0 : vector<1x32x8xf32> to vector<32x8xf32>
    %c0_2 = arith.constant 0 : index
    %c0_3 = arith.constant 0 : index
    %2 = vector.load %arg3[%c0_2, %c0_3] : memref<8x24xf32, #tpu.memory_space<vmem>>, vector<8x24xf32>
    %cst = arith.constant dense<0.000000e+00> : vector<32x24xf32>
    %3 = tpu.matmul %1, %2, %cst {dimension_numbers = #tpu.dot_dimension_numbers<[1], [0], [0], [1], [0, 0, 1, 1], [], []>} : vector<32x8xf32>, vector<8x24xf32>, vector<32x24xf32> -> vector<32x24xf32>
    %4 = vector.shape_cast %3 : vector<32x24xf32> to vector<8x4x24xf32>
    %5 = vector.extract_strided_slice %4 {offsets = [0, 0, 0], sizes = [8, 4, 8], strides = [1, 1, 1]} : vector<8x4x24xf32> to vector<8x4x8xf32>
    %6 = vector.extract_strided_slice %4 {offsets = [0, 0, 8], sizes = [8, 4, 8], strides = [1, 1, 1]} : vector<8x4x24xf32> to vector<8x4x8xf32>
    %7 = vector.extract_strided_slice %4 {offsets = [0, 0, 16], sizes = [8, 4, 8], strides = [1, 1, 1]} : vector<8x4x24xf32> to vector<8x4x8xf32>
    "tpu.trace_start"() <{level = 10 : i32, message = "ghd,gid->ghi"}> : () -> ()
    %cst_4 = arith.constant dense<0.000000e+00> : vector<8x4x4xf32>
    %8 = tpu.matmul %5, %6, %cst_4 {dimension_numbers = #tpu.dot_dimension_numbers<[2], [2], [1], [1], [0, 0, 0, 1, 1, 1], [0], [0]>} : vector<8x4x8xf32>, vector<8x4x8xf32>, vector<8x4x4xf32> -> vector<8x4x4xf32>
    "tpu.trace_stop"() : () -> ()
    %cst_5 = arith.constant dense<0xFF800000> : vector<8x4xf32>
    %9 = vector.multi_reduction <maximumf>, %8, %cst_5 [2] : vector<8x4x4xf32> to vector<8x4xf32>
    %10 = vector.shape_cast %9 : vector<8x4xf32> to vector<8x4x1xf32>
    %11 = vector.broadcast %10 : vector<8x4x1xf32> to vector<8x4x4xf32>
    %12 = arith.subf %8, %11 : vector<8x4x4xf32>
    %13 = math.exp %12 : vector<8x4x4xf32>
    %cst_6 = arith.constant dense<0.000000e+00> : vector<8x4xf32>
    %14 = vector.multi_reduction <add>, %13, %cst_6 [2] : vector<8x4x4xf32> to vector<8x4xf32>
    %15 = vector.shape_cast %14 : vector<8x4xf32> to vector<8x4x1xf32>
    %16 = tpu.reciprocal %15 {approx = true} : vector<8x4x1xf32> -> vector<8x4x1xf32>
    %17 = vector.broadcast %16 : vector<8x4x1xf32> to vector<8x4x4xf32>
    %18 = arith.mulf %13, %17 : vector<8x4x4xf32>
    "tpu.trace_start"() <{level = 10 : i32, message = "ghi,gid->ghd"}> : () -> ()
    %cst_7 = arith.constant dense<0.000000e+00> : vector<8x4x8xf32>
    %19 = tpu.matmul %18, %7, %cst_7 {dimension_numbers = #tpu.dot_dimension_numbers<[2], [1], [1], [2], [0, 0, 0, 1, 1, 2], [0], [0]>} : vector<8x4x4xf32>, vector<8x4x8xf32>, vector<8x4x8xf32> -> vector<8x4x8xf32>
    "tpu.trace_stop"() : () -> ()
    %20 = vector.extract_strided_slice %19 {offsets = [0, 0, 0], sizes = [8, 1, 8], strides = [1, 1, 1]} : vector<8x4x8xf32> to vector<8x1x8xf32>
    %21 = vector.shape_cast %20 : vector<8x1x8xf32> to vector<8x8xf32>
    %c0_8 = arith.constant 0 : index
    %c0_9 = arith.constant 0 : index
    %c0_10 = arith.constant 0 : index
    %c0_11 = arith.constant 0 : index
    %22 = vector.load %arg4[%c0_8, %c0_9, %c0_10, %c0_11] : memref<1x4x8x8xf32, #tpu.memory_space<vmem>>, vector<1x1x8x8xf32>
    %23 = vector.shape_cast %22 : vector<1x1x8x8xf32> to vector<8x8xf32>
    %24 = vector.shape_cast %21 : vector<8x8xf32> to vector<1x1x8x8xf32>
    tpu.vector_store %arg4[%c0_8, %c0_9, %c0_10, %c0_11], %24 {strides = array<i32>} : memref<1x4x8x8xf32, #tpu.memory_space<vmem>>, vector<1x1x8x8xf32>,
    %25 = vector.extract_strided_slice %19 {offsets = [0, 1, 0], sizes = [8, 1, 8], strides = [1, 1, 1]} : vector<8x4x8xf32> to vector<8x1x8xf32>
    %26 = vector.shape_cast %25 : vector<8x1x8xf32> to vector<8x8xf32>
    %c0_12 = arith.constant 0 : index
    %c1 = arith.constant 1 : index
    %c0_13 = arith.constant 0 : index
    %c0_14 = arith.constant 0 : index
    %27 = vector.load %arg4[%c0_12, %c1, %c0_13, %c0_14] : memref<1x4x8x8xf32, #tpu.memory_space<vmem>>, vector<1x1x8x8xf32>
    %28 = vector.shape_cast %27 : vector<1x1x8x8xf32> to vector<8x8xf32>
    %29 = vector.shape_cast %26 : vector<8x8xf32> to vector<1x1x8x8xf32>
    tpu.vector_store %arg4[%c0_12, %c1, %c0_13, %c0_14], %29 {strides = array<i32>} : memref<1x4x8x8xf32, #tpu.memory_space<vmem>>, vector<1x1x8x8xf32>,
    %30 = vector.extract_strided_slice %19 {offsets = [0, 2, 0], sizes = [8, 1, 8], strides = [1, 1, 1]} : vector<8x4x8xf32> to vector<8x1x8xf32>
    %31 = vector.shape_cast %30 : vector<8x1x8xf32> to vector<8x8xf32>
    %c0_15 = arith.constant 0 : index
    %c2 = arith.constant 2 : index
    %c0_16 = arith.constant 0 : index
    %c0_17 = arith.constant 0 : index
    %32 = vector.load %arg4[%c0_15, %c2, %c0_16, %c0_17] : memref<1x4x8x8xf32, #tpu.memory_space<vmem>>, vector<1x1x8x8xf32>
    %33 = vector.shape_cast %32 : vector<1x1x8x8xf32> to vector<8x8xf32>
    %34 = vector.shape_cast %31 : vector<8x8xf32> to vector<1x1x8x8xf32>
    tpu.vector_store %arg4[%c0_15, %c2, %c0_16, %c0_17], %34 {strides = array<i32>} : memref<1x4x8x8xf32, #tpu.memory_space<vmem>>, vector<1x1x8x8xf32>,
    %35 = vector.extract_strided_slice %19 {offsets = [0, 3, 0], sizes = [8, 1, 8], strides = [1, 1, 1]} : vector<8x4x8xf32> to vector<8x1x8xf32>
    %36 = vector.shape_cast %35 : vector<8x1x8xf32> to vector<8x8xf32>
    %c0_18 = arith.constant 0 : index
    %c3 = arith.constant 3 : index
    %c0_19 = arith.constant 0 : index
    %c0_20 = arith.constant 0 : index
    %37 = vector.load %arg4[%c0_18, %c3, %c0_19, %c0_20] : memref<1x4x8x8xf32, #tpu.memory_space<vmem>>, vector<1x1x8x8xf32>
    %38 = vector.shape_cast %37 : vector<1x1x8x8xf32> to vector<8x8xf32>
    %39 = vector.shape_cast %36 : vector<8x8xf32> to vector<1x1x8x8xf32>
    tpu.vector_store %arg4[%c0_18, %c3, %c0_19, %c0_20], %39 {strides = array<i32>} : memref<1x4x8x8xf32, #tpu.memory_space<vmem>>, vector<1x1x8x8xf32>,
    return
  }
  func.func @transform_0(%arg0: i32, %arg1: i32) -> (i32, i32, i32) {
    %c0_i32 = arith.constant 0 : i32
    %c0_i32_0 = arith.constant 0 : i32
    return %arg0, %arg1, %c0_i32 : i32, i32, i32
  }
  func.func @transform_1(%arg0: i32, %arg1: i32) -> (i32, i32) {
    %c0_i32 = arith.constant 0 : i32
    %c0_i32_0 = arith.constant 0 : i32
    %c0_i32_1 = arith.constant 0 : i32
    return %c0_i32, %c0_i32_0 : i32, i32
  }
  func.func @transform_2(%arg0: i32, %arg1: i32) -> (i32, i32, i32, i32) {
    %c0_i32 = arith.constant 0 : i32
    %c0_i32_0 = arith.constant 0 : i32
    %c0_i32_1 = arith.constant 0 : i32
    return %arg0, %c0_i32, %arg1, %c0_i32_0 : i32, i32, i32, i32
  }
}

</mosaic_0001>

<bundles_post_ra>
// kernel: multi_head_attention.3
= control target key start
LH: loop header
LB: loop body
LE: loop exit
PB: predicated region body
PF: predicated region fallthrough
CT: control target
= control target key end

     0   :  { %s162_s0 = inlined_call_operand.vmem [shape: f32[16,32], index: 0, kind: input, shape index: {}]   ;;  %s163_s1 = inlined_call_operand.vmem [shape: f32[32,32], index: 1, kind: input, shape index: {}]   ;;  %s164_s2 = inlined_call_operand.vmem [shape: f32[1,32], index: 2, kind: input, shape index: {}]   ;;  %s165_s3 = inlined_call_operand.hbm [shape: f32[16,32], index: 3, kind: output, shape index: {}]  }
   0x1   :  { %v20_v0 = vld [vmem:[%s163_s1 + $0x18] sm:$0xff]  ;;  %v19_v1 = vld [vmem:[%s163_s1 + $0x10] sm:$0xff]  ;;  %v18_v2 = vld [vmem:[%s163_s1 + $0x8] sm:$0xff] }
   0x2   :  { %44 = vmatpush.msra.mxu0 %v20_v0  ;;  %77 = vmatpush.msra.mxu1 %v20_v0 }
   0x3   :  { %8 = vsyncpa [#allocation3], 0  ;;  %v17_v3 = vld [vmem:[%s163_s1] sm:$0xff]  ;;  %vm25_vm0 = vcmask 261120   ;;  %v16_v5 = vld [vmem:[%s162_s0 + $0x8] sm:$0xff]  ;;  %s111_s1 = smov [#allocation2]  }
   0x4   :  { %45 = vmatpush.msra.mxu0 %v19_v1  ;;  %78 = vmatpush.msra.mxu1 %v19_v1  ;;  %v15_v4 = vld [vmem:[%s162_s0] sm:$0xff]  ;;  %s61_s26 = sshll.u32 %s111_s1, 4  ;;  %s63_s29 = sshll.u32 %s165_s3, 4  ;;  %s62_s26 = int_to_ptr.vmem [resolvable:$true] %s61_s26  ;;  %s64_s29 = int_to_ptr.hbm [resolvable:$true] %s63_s29 }
   0x5   :  { %v84_v6 = vld [vmem:[%s164_s2] ss:$0 sm:$0xff]  ;;  %s112_s0 = smov 128   ;;  %s113_s30 = smov 8  }
   0x6   :  { %46 = vmatpush.msra.mxu0 %v18_v2  ;;  %79 = vmatpush.msra.mxu1 %v18_v2 }
   0x8   :  { %47 = vmatpush.msra.mxu0 %v17_v3  ;;  %80 = vmatpush.msra.mxu1 %v17_v3 }
   0x9   :  { %75 = vmatmul.msk.f32.vlgmr.msra.gmra.mxu0 %vm25_vm0, %v15_v4  ;;  %76 = vmatmul.msk.f32.vlgmr.msra.gmra.mxu1 %vm25_vm0, %v16_v5 }
  0x86   :  { %v49_v7 = vpop.f32.mrf.mxu0  ;;  %v52_v8 = vpop.f32.mrf.mxu1 }
  0x87   :  { %v50_v9 = vadd.f32 %v84_v6, %v49_v7  ;;  %v53_v10 = vadd.f32 %v84_v6, %v52_v8 }
  0x89   :  { %55 = vst.msk [vmem:[#allocation2] sm:$0xff] %vm25_vm0, %v50_v9 }
  0x8a   :  { %56 = vst.msk [vmem:[#allocation2 + $0x8] sm:$0xff] %vm25_vm0, %v53_v10 }
  0x8b   :  { %69 = dma.vmem_to_hbm [thread:$0]  %s62_s26, 256, %s64_s29, [#allocation3], %s112_s0, %s112_s0, %s113_s30  }
  0x8c   :  { %109 = dma.done.wait [#allocation3], 256  }
  0x8d   :  { %110 = vsyncadd [#allocation3], 4294967040 }
  0x8e   :  { %74 = vsyncpa [#allocation3], 1 }

// kernel: multi_head_attention.2
= control target key start
LH: loop header
LB: loop body
LE: loop exit
PB: predicated region body
PF: predicated region fallthrough
CT: control target
= control target key end

     0   :  { %s1089_s9 = smov 0   ;;  %s1091_s10 = smov 0   ;;  %s1259_s0 = inlined_call_operand.vmem [shape: f32[2,32,8], index: 0, kind: input, shape index: {}]   ;;  %s1260_s1 = inlined_call_operand.vmem [shape: f32[8,24], index: 1, kind: input, shape index: {}]   ;;  %s1261_s2 = inlined_call_operand.vmem [shape: f32[2,4,8,8], index: 2, kind: output, shape index: {}]  }
   0x1   :  { %s1093_s11 = smov 0  }
   0x2 LB: > { %s24_s12 = sadd.s32 1, %s1066_s10  ;;  %p939_p0 = scmp.ge.s32.totalorder %s1070_s11, 1  ;;  %s1070_s11 = sphi %s1093_s11, %s12_s11   ;;  %s1066_s10 = sphi %s1091_s10, %s1263_s10   ;;  %s1062_s9 = sphi %s1089_s9, %s1262_s9  }
   0x3   : > { %p26_p1 = scmp.ge.s32.totalorder %s24_s12, 2  ;;  %p133_p2 = scmp.lt.s32.totalorder %s1070_s11, 3 }
   0x5   : > { %s1265_s12 = smov (%p26_p1, %s24_s12), 0  ;;  %p134_p3 = pnand %p939_p0, %p133_p2 }
   0x6   : > { %p163_p4 = scmp.lt.s32.totalorder (!%p134_p3), %s1062_s9, 1  ;;  %s1072_s19 = smov (!%p134_p3), 120  }
   0x7   : > { %137 = sbr.rel (%p134_p3) target bundleno = 913 (0x391), region = 28  ;;  %s1073_s20 = smov (!%p134_p3), 112  }
   0xc   : > { %v184_v0 = vld [vmem:[%s1260_s1] sm:$0xff]  ;;  %s1267_s9 = smov (!%p163_p4, %s1062_s9), 1  ;;  %vm185_vm0 = vcmask 64512   ;;  %vm459_vm1 = vcmask 27648   ;;  %vm556_vm2 = vcmask 1043456   ;;  %vm552_vm3 = vcmask 31744  }
   0xd   : > { %213 = vmatpush.msra.mxu0 %v184_v0  ;;  %s988_s15 = sshll.u32 %s1267_s9, 5  ;;  %vm791_vm4 = vcmask 1041409   ;;  %vm794_vm5 = vcmask 1042434   ;;  %vm797_vm6 = vcmask 1043459   ;;  %vm800_vm7 = vcmask 1044484  }
   0xe   : > { %s170_s18 = scalar_lea.vmem %s1259_s0, %s988_s15  ;;  %vm803_vm8 = vcmask 1045509   ;;  %vm806_vm9 = vcmask 1046534   ;;  %vm809_vm10 = vcmask 1047559   ;;  %vm848_vm11 = vcmask 64515   ;;  %s1218_s23 = scalar_lea.vmem %s1261_s2, %s988_s15 }
   0xf   : > { %v180_v1 = vld [vmem:[%s170_s18] sm:$0xff]  ;;  %v181_v2 = vld [vmem:[%s170_s18 + $0x8] sm:$0xff]  ;;  %v182_v3 = vld [vmem:[%s170_s18 + $0x10] sm:$0xff]  ;;  %vm824_vm12 = vcmask 57344   ;;  %vm837_vm13 = vcmask 58368   ;;  %vm835_vm14 = vcmask 64514  }
  0x10   : > { %944 = vmatmul.msk.f32.vlgmr.msra.gmra.mxu0 %vm185_vm0, %v180_v1  ;;  %v183_v4 = vld [vmem:[%s170_s18 + $0x18] sm:$0xff]  ;;  %vm822_vm15 = vcmask 64513  }
  0x18   : > { %945 = vmatmul.msk.f32.gmra.mxu0 %vm185_vm0, %v181_v2 }
  0x20   : > { %946 = vmatmul.msk.f32.gmra.mxu0 %vm185_vm0, %v182_v3 }
  0x28   : > { %947 = vmatmul.msk.f32.gmra.mxu0 %vm185_vm0, %v183_v4 }
  0x8d   : > { %v215_v5 = vpop.f32.mrf.mxu0 }
  0x8e   : > { %235 = vst [vmem:[#allocation1] ss:$2 sm:$0xff] %v215_v5  ;;  %v231_v6 = vrot.slane %v215_v5, 4 }
  0x95   : > { %v236_v7 = vld.sshfl [vmem:[#allocation1] sm:$0xff pattern:$0x75316420]  ;;  %v218_v8 = vpop.f32.mrf.mxu0 }
  0x96   : > { %263 = vst [vmem:[#allocation1] ss:$2 sm:$0xff] %v231_v6  ;;  %v232_v10 = vrot.slane %v218_v8, 4 }
  0x9d   : > { %v264_v9 = vld.sshfl [vmem:[#allocation1] sm:$0xff pattern:$0x75316420]  ;;  %v221_v12 = vpop.f32.mrf.mxu0 }
  0x9e   : > { %291 = vst [vmem:[#allocation1] ss:$2 sm:$0xff] %v218_v8  ;;  %265 = vrot.lane.b32.xlu0 %v264_v9, %s1072_s19  ;;  %v233_v14 = vrot.slane %v221_v12, 4 }
  0xa5   : > { %v292_v11 = vld.sshfl [vmem:[#allocation1] sm:$0xff pattern:$0x75316420]  ;;  %v224_v16 = vpop.f32.mrf.mxu0 }
  0xa6   : > { %319 = vst [vmem:[#allocation1] ss:$2 sm:$0xff] %v232_v10  ;;  %237 = vrot.lane.b32.xlu0 %v236_v7, %s1072_s19  ;;  %293 = vrot.lane.b32.xlu1 %v292_v11, %s1072_s19  ;;  %v234_v18 = vrot.slane %v224_v16, 4 }
  0xad   : > { %v320_v13 = vld.sshfl [vmem:[#allocation1] sm:$0xff pattern:$0x75316420] }
  0xae   : > { %347 = vst [vmem:[#allocation1] ss:$2 sm:$0xff] %v221_v12  ;;  %321 = vrot.lane.b32.xlu2 %v320_v13, %s1072_s19 }
  0xb5   : > { %v348_v15 = vld.sshfl [vmem:[#allocation1] sm:$0xff pattern:$0x75316420] }
  0xb6   : > { %375 = vst [vmem:[#allocation1] ss:$2 sm:$0xff] %v233_v14  ;;  %349 = vrot.lane.b32.xlu1 %v348_v15, %s1072_s19 }
  0xbd   : > { %v376_v17 = vld.sshfl [vmem:[#allocation1] sm:$0xff pattern:$0x75316420] }
  0xbe   : > { %403 = vst [vmem:[#allocation1] ss:$2 sm:$0xff] %v224_v16  ;;  %377 = vrot.lane.b32.xlu0 %v376_v17, %s1072_s19 }
  0xc5   : > { %v404_v19 = vld.sshfl [vmem:[#allocation1] sm:$0xff pattern:$0x75316420] }
  0xc6   : > { %405 = vrot.lane.b32.xlu1 %v404_v19, %s1072_s19  ;;  %431 = vst [vmem:[#allocation1] ss:$2 sm:$0xff] %v234_v18 }
  0xcd   : > { %v432_v20 = vld.sshfl [vmem:[#allocation1] sm:$0xff pattern:$0x75316420] }
  0xce   : > { %433 = vrot.lane.b32.xlu2 %v432_v20, %s1072_s19  ;;  %548 = vst [vmem:[#allocation1] ss:$2 sm:$0xff] %v215_v5 }
  0xd5   : > { %v1122_v21 = vld.sshfl [vmem:[#allocation1] sm:$0xff pattern:$0x75316420] }
  0xd6   : > { %579 = vst [vmem:[#allocation1] ss:$2 sm:$0xff] %v231_v6 }
  0xdd   : > { %v1124_v22 = vld.sshfl [vmem:[#allocation1] sm:$0xff pattern:$0x75316420] }
  0xde   : > { %608 = vst [vmem:[#allocation1] ss:$2 sm:$0xff] %v218_v8 }
  0xe5   : > { %v609_v23 = vld.sshfl [vmem:[#allocation1] sm:$0xff pattern:$0x75316420] }
  0xe6   : > { %637 = vst [vmem:[#allocation1] ss:$2 sm:$0xff] %v232_v10 }
  0xed   : > { %v638_v24 = vld.sshfl [vmem:[#allocation1] sm:$0xff pattern:$0x75316420] }
  0xee   : > { %666 = vst [vmem:[#allocation1] ss:$2 sm:$0xff] %v221_v12 }
  0xf5   : > { %v1126_v25 = vld.sshfl [vmem:[#allocation1] sm:$0xff pattern:$0x75316420] }
  0xf6   : > { %695 = vst [vmem:[#allocation1] ss:$2 sm:$0xff] %v233_v14 }
  0xfd   : > { %v1128_v26 = vld.sshfl [vmem:[#allocation1] sm:$0xff pattern:$0x75316420] }
  0xfe   : > { %724 = vst [vmem:[#allocation1] ss:$2 sm:$0xff] %v224_v16 }
 0x105   : > { %v1130_v27 = vld.sshfl [vmem:[#allocation1] sm:$0xff pattern:$0x75316420] }
 0x106   : > { %753 = vst [vmem:[#allocation1] ss:$2 sm:$0xff] %v234_v18 }
 0x108   : > { %v322_v31 = vpop.permute.xlu2 %321 }
 0x110   : > { %v266_v28 = vpop.permute.xlu0 %265 }
 0x111   : > { %950 = vmatpush.xpose.msk.msra.mxu2 %vm185_vm0, %v266_v28 }
 0x114   : > { %951 = vmatmul.msk.f32.vlgmr.msra.gmra.mxu2 %vm185_vm0, %v231_v6 }
 0x118   : > { %v238_v29 = vpop.permute.xlu0 %237  ;;  %v294_v30 = vpop.permute.xlu1 %293 }
 0x119   : > { %948 = vmatpush.xpose.msk.msra.mxu1 %vm185_vm0, %v238_v29  ;;  %952 = vmatpush.xpose.msk.msra.mxu3 %vm185_vm0, %v294_v30 }
 0x11c   : > { %949 = vmatmul.msk.f32.vlgmr.msra.gmra.mxu1 %vm185_vm0, %v215_v5  ;;  %953 = vmatmul.msk.f32.vlgmr.msra.gmra.mxu3 %vm185_vm0, %v218_v8 }
 0x11d   : > { %954 = vmatpush.xpose.msk.msrb.mxu1 %vm185_vm0, %v322_v31  ;;  %v754_v31 = vld.sshfl [vmem:[#allocation1] sm:$0xff pattern:$0x75316420] }
 0x124   : > { %955 = vmatmul.msk.f32.vlgmr.msrb.gmra.mxu1 %vm185_vm0, %v232_v10 }
 0x128   : > { %v350_v32 = vpop.permute.xlu1 %349  ;;  %v434_v33 = vpop.permute.xlu2 %433 }
 0x129   : > { %956 = vmatpush.xpose.msk.msrb.mxu2 %vm185_vm0, %v350_v32 }
 0x12c   : > { %957 = vmatmul.msk.f32.vlgmr.msrb.gmra.mxu2 %vm185_vm0, %v221_v12 }
 0x12d   : > { %962 = vmatpush.xpose.msk.msra.mxu2 %vm185_vm0, %v434_v33 }
 0x130   : > { %v378_v34 = vpop.permute.xlu0 %377 }
 0x131   : > { %958 = vmatpush.xpose.msk.msrb.mxu3 %vm185_vm0, %v378_v34 }
 0x134   : > { %959 = vmatmul.msk.f32.vlgmr.msrb.gmra.mxu3 %vm185_vm0, %v233_v14  ;;  %963 = vmatmul.msk.f32.vlgmr.msra.gmra.mxu2 %vm185_vm0, %v234_v18 }
 0x138   : > { %v406_v35 = vpop.permute.xlu1 %405 }
 0x139   : > { %960 = vmatpush.xpose.msk.msra.mxu1 %vm185_vm0, %v406_v35 }
 0x13c   : > { %961 = vmatmul.msk.f32.vlgmr.msra.gmra.mxu1 %vm185_vm0, %v224_v16 }
 0x197   : > { %v288_v38 = vpop.f32.mrf.mxu2 }
 0x198   : > { %v463_v43 = vsel %vm459_vm1, %v288_v38, -inf }
 0x199   : > { %v260_v36 = vpop.f32.mrf.mxu1 }
 0x19a   : > { %v460_v37 = vsel %vm459_vm1, %v260_v36, -inf }
 0x19b   : > { %461 = vmax.xlane.f32.xlu2 %v460_v37 }
 0x19f   : > { %v316_v39 = vpop.f32.mrf.mxu3 }
 0x1a0   : > { %v466_v40 = vsel %vm459_vm1, %v316_v39, -inf }
 0x1a1   : > { %v344_v41 = vpop.f32.mrf.mxu1  ;;  %467 = vmax.xlane.f32.xlu0 %v466_v40 }
 0x1a2   : > { %v469_v42 = vsel %vm459_vm1, %v344_v41, -inf }
 0x1a3   : > { %470 = vmax.xlane.f32.xlu1 %v469_v42  ;;  %464 = vmax.xlane.f32.xlu2 %v463_v43 }
 0x1af   : > { %v372_v44 = vpop.f32.mrf.mxu2 }
 0x1b0   : > { %v472_v45 = vsel %vm459_vm1, %v372_v44, -inf }
 0x1b1   : > { %473 = vmax.xlane.f32.xlu1 %v472_v45 }
 0x1b7   : > { %v400_v46 = vpop.f32.mrf.mxu3  ;;  %v1153_v47 = vpop.f32.mrf.mxu2 }
 0x1b8   : > { %v475_v48 = vsel %vm459_vm1, %v400_v46, -inf  ;;  %v481_v49 = vsel %vm459_vm1, %v1153_v47, -inf }
 0x1b9   : > { %476 = vmax.xlane.f32.xlu2 %v475_v48  ;;  %482 = vmax.xlane.f32.xlu0 %v481_v49  ;;  %v428_v50 = vpop.f32.mrf.mxu1 }
 0x1ba   : > { %v478_v51 = vsel %vm459_vm1, %v428_v50, -inf }
 0x1c1   : > { %479 = vmax.xlane.f32.xlu2 %v478_v51 }
 0x1ca   : > { %639 = vrot.lane.b32.xlu1 %v638_v24, %s1073_s20 }
 0x1cd   : > { %550 = vrot.lane.b32.xlu0 %v1122_v21, %s1073_s20 }
 0x1d9   : > { %610 = vrot.lane.b32.xlu2 %v609_v23, %s1073_s20 }
 0x20e   : > { %v462_v52 = vpop.xlane.xlu2 %461 }
 0x20f   : > { %v484_v53 = vsub.f32 %v260_v36, %v462_v52 }
 0x211   : > { %v492_v54 = vmul.f32 1.442695, %v484_v53 }
 0x213   : > { %1016 = vpow2.f32 %v492_v54 }
 0x214   : > { %v468_v57 = vpop.xlane.xlu0 %467 }
 0x215   : > { %v486_v63 = vsub.f32 %v316_v39, %v468_v57 }
 0x216   : > { %v471_v55 = vpop.xlane.xlu1 %470  ;;  %v465_v56 = vpop.xlane.xlu2 %464 }
 0x217   : > { %v487_v58 = vsub.f32 %v344_v41, %v471_v55  ;;  %v485_v59 = vsub.f32 %v288_v38, %v465_v56  ;;  %v496_v1 = vmul.f32 1.442695, %v486_v63 }
 0x219   : > { %v1163_v60 = vpop.eup %1016  ;;  %v498_v61 = vmul.f32 1.442695, %v487_v58  ;;  %v494_v62 = vmul.f32 1.442695, %v485_v59 }
 0x21a   : > { %v508_v0 = vsel %vm459_vm1, %v1163_v60, 0.0 }
 0x21b   : > { %1018 = vpow2.f32 %v498_v61  ;;  %509 = vadd.xlane.f32.xlu0 %v508_v0 }
 0x21c   : > { %1020 = vpow2.f32 %v494_v62 }
 0x21d   : > { %1022 = vpow2.f32 %v496_v1 }
 0x221   : > { %v1019_v2 = vpop.eup %1018 }
 0x222   : > { %v1167_v3 = vpop.eup %1020  ;;  %v517_v4 = vsel %vm459_vm1, %v1019_v2, 0.0 }
 0x223   : > { %518 = vadd.xlane.f32.xlu2 %v517_v4  ;;  %v511_v5 = vsel %vm459_vm1, %v1167_v3, 0.0  ;;  %v1023_v9 = vpop.eup %1022 }
 0x224   : > { %512 = vadd.xlane.f32.xlu1 %v511_v5  ;;  %v474_v6 = vpop.xlane.xlu1 %473  ;;  %v514_v10 = vsel %vm459_vm1, %v1023_v9, 0.0 }
 0x225   : > { %v488_v7 = vsub.f32 %v372_v44, %v474_v6 }
 0x227   : > { %v500_v8 = vmul.f32 1.442695, %v488_v7 }
 0x229   : > { %1024 = vpow2.f32 %v500_v8 }
 0x22c   : > { %515 = vadd.xlane.f32.xlu1 %v514_v10  ;;  %v477_v11 = vpop.xlane.xlu2 %476  ;;  %v483_v16 = vpop.xlane.xlu0 %482 }
 0x22d   : > { %v489_v17 = vsub.f32 %v400_v46, %v477_v11  ;;  %v491_v32 = vsub.f32 %v1153_v47, %v483_v16 }
 0x22f   : > { %v1173_v12 = vpop.eup %1024  ;;  %v502_v19 = vmul.f32 1.442695, %v489_v17  ;;  %v506_v33 = vmul.f32 1.442695, %v491_v32 }
 0x230   : > { %v520_v13 = vsel %vm459_vm1, %v1173_v12, 0.0 }
 0x231   : > { %521 = vadd.xlane.f32.xlu0 %v520_v13 }
 0x234   : > { %v480_v14 = vpop.xlane.xlu2 %479 }
 0x235   : > { %v490_v15 = vsub.f32 %v428_v50, %v480_v14 }
 0x237   : > { %v504_v18 = vmul.f32 1.442695, %v490_v15 }
 0x239   : > { %1026 = vpow2.f32 %v504_v18 }
 0x23a   : > { %1028 = vpow2.f32 %v502_v19 }
 0x23b   : > { %1030 = vpow2.f32 %v506_v33 }
 0x23c   : > { %v611_v20 = vpop.permute.xlu2 %610  ;;  %v640_v24 = vpop.permute.xlu1 %639 }
 0x23d   : > { %968 = vmatpush.msk.msrb.mxu2 %vm556_vm2, %v611_v20 }
 0x23f   : > { %v1027_v21 = vpop.eup %1026  ;;  %v551_v23 = vpop.permute.xlu0 %550 }
 0x240   : > { %964 = vmatpush.msk.msra.mxu3 %vm556_vm2, %v551_v23  ;;  %v526_v28 = vsel %vm459_vm1, %v1027_v21, 0.0  ;;  %v1029_v29 = vpop.eup %1028 }
 0x241   : > { %527 = vadd.xlane.f32.xlu2 %v526_v28  ;;  %v523_v30 = vsel %vm459_vm1, %v1029_v29, 0.0  ;;  %v1031_v34 = vpop.eup %1030 }
 0x242   : > { %970 = vmatpush.msk.msrb.mxu3 %vm556_vm2, %v640_v24  ;;  %v529_v35 = vsel %vm459_vm1, %v1031_v34, 0.0  ;;  %vm850_vm1 = vcmask 59392  }
 0x245   : > { %581 = vrot.lane.b32.xlu1 %v1124_v22, %s1073_s20  ;;  %668 = vrot.lane.b32.xlu0 %v1126_v25, %s1073_s20 }
 0x249   : > { %524 = vadd.xlane.f32.xlu2 %v523_v30 }
 0x24d   : > { %726 = vrot.lane.b32.xlu1 %v1130_v27, %s1073_s20 }
 0x255   : > { %755 = vrot.lane.b32.xlu1 %v754_v31, %s1073_s20 }
 0x27f   : > { %530 = vadd.xlane.f32.xlu1 %v529_v35 }
 0x28e   : > { %v510_v22 = vpop.xlane.xlu0 %509 }
 0x28f   : > { %1032 = vrcp.f32 %v510_v22 }
 0x295   : > { %v1033_v25 = vpop.eup %1032 }
 0x296   : > { %v540_v36 = vmul.f32 %v1033_v25, %v1163_v60  ;;  %v519_v37 = vpop.xlane.xlu2 %518 }
 0x297   : > { %1034 = vrcp.f32 %v519_v37  ;;  %v513_v27 = vpop.xlane.xlu1 %512 }
 0x298   : > { %697 = vrot.lane.b32.xlu1 %v1128_v26, %s1073_s20  ;;  %965 = vmatmul.msk.f32.vlgmr.msra.gmra.mxu3 %vm552_vm3, %v540_v36 }
 0x29d   : > { %v1035_v38 = vpop.eup %1034 }
 0x29e   : > { %v543_v39 = vmul.f32 %v1035_v38, %v1019_v2 }
 0x29f   : > { %v516_v40 = vpop.xlane.xlu1 %515 }
 0x2a0   : > { %1036 = vrcp.f32 %v516_v40  ;;  %971 = vmatmul.msk.f32.vlgmr.msrb.gmra.mxu3 %vm552_vm3, %v543_v39 }
 0x2a1   : > { %1038 = vrcp.f32 %v513_v27 }
 0x2a4   : > { %v522_v43 = vpop.xlane.xlu0 %521 }
 0x2a5   : > { %1040 = vrcp.f32 %v522_v43 }
 0x2a6   : > { %v1037_v41 = vpop.eup %1036 }
 0x2a7   : > { %v542_v42 = vmul.f32 %v1037_v41, %v1023_v9  ;;  %v1039_v44 = vpop.eup %1038 }
 0x2a8   : > { %v541_v26 = vmul.f32 %v1039_v44, %v1167_v3 }
 0x2a9   : > { %969 = vmatmul.msk.f32.vlgmr.msrb.gmra.mxu2 %vm552_vm3, %v542_v42 }
 0x2ab   : > { %v1041_v45 = vpop.eup %1040 }
 0x2ac   : > { %v544_v49 = vmul.f32 %v1041_v45, %v1173_v12 }
 0x2b4   : > { %v528_v46 = vpop.xlane.xlu2 %527 }
 0x2b5   : > { %1042 = vrcp.f32 %v528_v46 }
 0x2b7   : > { %v582_v47 = vpop.permute.xlu1 %581  ;;  %v669_v48 = vpop.permute.xlu0 %668 }
 0x2b8   : > { %966 = vmatpush.msk.msrb.mxu1 %vm556_vm2, %v582_v47  ;;  %972 = vmatpush.msk.msrb.mxu0 %vm556_vm2, %v669_v48 }
 0x2b9   : > { %967 = vmatmul.msk.f32.vlgmr.msrb.gmra.mxu1 %vm552_vm3, %v541_v26  ;;  %973 = vmatmul.msk.f32.vlgmr.msrb.gmra.mxu0 %vm552_vm3, %v544_v49 }
 0x2bb   : > { %v1043_v50 = vpop.eup %1042 }
 0x2bc   : > { %v546_v51 = vmul.f32 %v1043_v50, %v1027_v21  ;;  %v525_v57 = vpop.xlane.xlu2 %524 }
 0x2bf   : > { %v727_v52 = vpop.permute.xlu1 %726 }
 0x2c0   : > { %976 = vmatpush.msk.msra.mxu2 %vm556_vm2, %v727_v52 }
 0x2c1   : > { %977 = vmatmul.msk.f32.vlgmr.msra.gmra.mxu2 %vm552_vm3, %v546_v51 }
 0x2c7   : > { %v756_v53 = vpop.permute.xlu1 %755 }
 0x2c8   : > { %978 = vmatpush.msk.msra.mxu3 %vm556_vm2, %v756_v53 }
 0x2f2   : > { %v531_v54 = vpop.xlane.xlu1 %530 }
 0x2f3   : > { %1044 = vrcp.f32 %v531_v54 }
 0x2f4   : > { %1046 = vrcp.f32 %v525_v57 }
 0x2f9   : > { %v1045_v55 = vpop.eup %1044 }
 0x2fa   : > { %v547_v56 = vmul.f32 %v1045_v55, %v1031_v34  ;;  %v1047_v58 = vpop.eup %1046 }
 0x2fb   : > { %v545_v59 = vmul.f32 %v1047_v58, %v1029_v29 }
 0x2fc   : > { %979 = vmatmul.msk.f32.vlgmr.msra.gmra.mxu3 %vm552_vm3, %v547_v56 }
 0x30a   : > { %v698_v60 = vpop.permute.xlu1 %697 }
 0x30b   : > { %974 = vmatpush.msk.msra.mxu1 %vm556_vm2, %v698_v60 }
 0x30c   : > { %975 = vmatmul.msk.f32.vlgmr.msra.gmra.mxu1 %vm552_vm3, %v545_v59 }
 0x31b   : > { %v576_v61 = vpop.f32.mrf.mxu3 }
 0x323   : > { %v663_v62 = vpop.f32.mrf.mxu3 }
 0x324   : > { %v796_v3 = vrot.slane %v663_v62, 5 }
 0x32c   : > { %v634_v63 = vpop.f32.mrf.mxu2 }
 0x32d   : > { %v793_v4 = vrot.slane %v634_v63, 6 }
 0x336   : > { %v605_v0 = vpop.f32.mrf.mxu1  ;;  %v692_v1 = vpop.f32.mrf.mxu0 }
 0x337   : > { %v790_v2 = vrot.slane %v605_v0, 7  ;;  %v799_v5 = vrot.slane %v692_v1, 4 }
 0x339   : > { %v792_v6 = vsel %vm791_vm4, %v790_v2, %v576_v61  ;;  %v813_v7 = vsel %vm794_vm5, %v790_v2, %v576_v61  ;;  %v826_v8 = vsel %vm797_vm6, %v790_v2, %v576_v61  ;;  %v839_v9 = vsel %vm800_vm7, %v790_v2, %v576_v61 }
 0x33a   : > { %v795_v10 = vsel %vm794_vm5, %v793_v4, %v792_v6  ;;  %v814_v11 = vsel %vm797_vm6, %v793_v4, %v813_v7  ;;  %v827_v12 = vsel %vm800_vm7, %v793_v4, %v826_v8  ;;  %v840_v13 = vsel %vm803_vm8, %v793_v4, %v839_v9 }
 0x33b   : > { %v798_v14 = vsel %vm797_vm6, %v796_v3, %v795_v10  ;;  %v815_v15 = vsel %vm800_vm7, %v796_v3, %v814_v11  ;;  %v828_v16 = vsel %vm803_vm8, %v796_v3, %v827_v12  ;;  %v841_v17 = vsel %vm806_vm9, %v796_v3, %v840_v13 }
 0x33c   : > { %v801_v18 = vsel %vm800_vm7, %v799_v5, %v798_v14  ;;  %v816_v19 = vsel %vm803_vm8, %v799_v5, %v815_v15  ;;  %v829_v20 = vsel %vm806_vm9, %v799_v5, %v828_v16  ;;  %v842_v21 = vsel %vm809_vm10, %v799_v5, %v841_v17 }
 0x33d   : > { %984 = vst.msk [vmem:[%s1218_s23 + $0x15] sm:$0xf8] %vm848_vm11, %v842_v21 }
 0x344   : > { %v750_v23 = vpop.f32.mrf.mxu2 }
 0x345   : > { %v805_v28 = vrot.slane %v750_v23, 2 }
 0x37f   : > { %v779_v24 = vpop.f32.mrf.mxu3 }
 0x380   : > { %v808_v29 = vrot.slane %v779_v24, 1 }
 0x382   : > { %981 = vst.msk [vmem:[%s1218_s23 + $0xf] sm:$0x1] %vm824_vm12, %v808_v29  ;;  %v831_v30 = vsel %vm791_vm4, %v808_v29, %v805_v28 }
 0x383   : > { %983 = vst.msk [vmem:[%s1218_s23 + $0x16] sm:$0x3] %vm837_vm13, %v831_v30 }
 0x389   : > { %v721_v31 = vpop.f32.mrf.mxu1 }
 0x38a   : > { %v802_v32 = vrot.slane %v721_v31, 3 }
 0x38c   : > { %v804_v33 = vsel %vm803_vm8, %v802_v32, %v801_v18  ;;  %v817_v34 = vsel %vm806_vm9, %v802_v32, %v816_v19  ;;  %v830_v35 = vsel %vm809_vm10, %v802_v32, %v829_v20  ;;  %v843_v22 = vsel %vm791_vm4, %v805_v28, %v802_v32 }
 0x38d   : > { %v807_v25 = vsel %vm806_vm9, %v805_v28, %v804_v33  ;;  %v818_v36 = vsel %vm809_vm10, %v805_v28, %v817_v34  ;;  %982 = vst.msk [vmem:[%s1218_s23 + $0xe] sm:$0xfc] %vm835_vm14, %v830_v35  ;;  %v844_v37 = vsel %vm794_vm5, %v808_v29, %v843_v22 }
 0x38e   : > { %v810_v27 = vsel %vm809_vm10, %v808_v29, %v807_v25  ;;  %980 = vst.msk [vmem:[%s1218_s23 + $0x7] sm:$0xfe] %vm822_vm15, %v818_v36 }
 0x38f   : > { %812 = vst.msk [vmem:[%s1218_s23] sm:$0xff] %vm185_vm0, %v810_v27 }
 0x390   : > { %985 = vst.msk [vmem:[%s1218_s23 + $0x1d] sm:$0x7] %vm850_vm1, %v844_v37 }
 0x391 PF: > { %s12_s11 = sadd.s32 1, %s1070_s11   ;;  %s1262_s9 = smov %s1066_s10 }
 0x392   : > { %p9_p5 = scmp.ge.s32.totalorder %s12_s11, 4   ;;  %s1263_s10 = smov %s1265_s12 }
 0x394   :  { %11 = sbr.rel (!%p9_p5) target bundleno = 2 (0x2), region = 61 }

</bundles_post_ra>
